<compile_context>
chip_gen: v5e
topology: v5e:2x2
jax: 0.10.0
libtpu: 0.0.40
codegen_flags: <defaults>
</compile_context>

<pallas_src>
from functools import partial

import jax
import jax.numpy as jnp
from jax import lax
from jax.experimental import pallas as pl
from jax.experimental.pallas import tpu as pltpu


_TARGET_BLOCK_BYTES = 4 * 1024 * 1024   # per-block target: 2*(in)+2*(out)
                                        # double buffers stay under the scoped
                                        # VMEM defaults on v5e/v6e/v7x.


def se_kernel(x_ref, w1_ref, w2_ref, o_ref, *, hw, b_blk):
    # x_ref / o_ref: (b_blk, C, HW) -- NCHW-native, HW on the lane axis.
    # w1_ref: (C//r, C), w2_ref: (C, C//r) -- torch nn.Linear weight layout,
    # small resident VMEM blocks (constant index_map), fed to the MXU in
    # their native dtype.
    inv_hw = 1.0 / hw
    x_dtype = x_ref.dtype
    # Constant ones column, hoisted above the per-batch loop: lets the MXU do
    # the global-average-pool with f32 accumulation (no iota / integer-divide
    # mask building, no f32 copy of x).
    ones_col = jnp.ones((hw, 1), dtype=x_dtype)

    def process(b):
        xb = x_ref[b]                                                 # (C, HW)
        # --- squeeze: global average pool over HW (MXU, f32 accumulation) ---
        pooled = jnp.dot(xb, ones_col,
                         preferred_element_type=jnp.float32) * inv_hw  # (C, 1)
        # --- excitation: C -> C//r -> C (MXU), ReLU, sigmoid (EUP) ---
        h = jnp.dot(w1_ref[...], pooled.astype(w1_ref.dtype),
                    preferred_element_type=jnp.float32)               # (C//r, 1)
        h = jnp.maximum(h, 0.0)
        y = jax.nn.sigmoid(
            jnp.dot(w2_ref[...], h.astype(w2_ref.dtype),
                    preferred_element_type=jnp.float32))              # (C, 1)
        # --- scale: per-channel gate broadcast along the lane (HW) axis ---
        # plain VPU multiply; no scatter matmul, no relayout.
        o_ref[b] = (xb * y.astype(x_dtype)).astype(o_ref.dtype)

    if b_blk <= 8:
        for b in range(b_blk):     # short static unroll: full scheduler visibility
            process(b)
    else:
        def body(b, carry):
            process(b)
            return carry
        lax.fori_loop(0, b_blk, body, 0)


def _pick_block_batch(B, bytes_per_batch):
    """Largest divisor of B giving a block <= ~4 MiB while keeping >= 2 grid
    steps (even step counts preferred for dual-TC chips)."""
    if B == 1:
        return 1
    cands = [bb for bb in range(1, B)
             if B % bb == 0 and bb * bytes_per_batch <= _TARGET_BLOCK_BYTES]
    if not cands:
        return 1                    # a single batch element already exceeds target
    even = [bb for bb in cands if (B // bb) % 2 == 0]
    return max(even) if even else max(cands)


def se_layer(x, w1, w2, *, block_batch=None):
    """SELayer forward.  x: (B, C, H, W) NCHW.
    w1: (C//r, C) == torch fc[0].weight (Linear(C,    C//r, bias=False))
    w2: (C, C//r) == torch fc[2].weight (Linear(C//r, C,    bias=False))."""
    B, C, H, W = x.shape
    HW = H * W
    Cr, C_in = w1.shape
    assert C_in == C and w2.shape == (C, Cr)

    x3 = x.reshape(B, C, HW)        # free view: no transpose, no extra HBM traffic

    bytes_per_batch = C * HW * x.dtype.itemsize
    if block_batch is None:
        block_batch = _pick_block_batch(B, bytes_per_batch)
    assert B % block_batch == 0, "block_batch must divide the batch"
    grid = (B // block_batch,)

    kernel = partial(se_kernel, hw=HW, b_blk=block_batch)
    out3 = pl.pallas_call(
        kernel,
        out_shape=jax.ShapeDtypeStruct((B, C, HW), x.dtype),
        grid_spec=pltpu.PrefetchScalarGridSpec(
            num_scalar_prefetch=0,
            grid=grid,
            in_specs=[
                pl.BlockSpec((block_batch, C, HW), lambda i: (i, 0, 0)),
                pl.BlockSpec(w1.shape, lambda i: (0, 0)),   # resident weights
                pl.BlockSpec(w2.shape, lambda i: (0, 0)),
            ],
            out_specs=pl.BlockSpec((block_batch, C, HW), lambda i: (i, 0, 0)),
        ),
        compiler_params=pltpu.CompilerParams(
            dimension_semantics=("parallel",),
            vmem_limit_bytes=32 * 1024 * 1024),
    )(x3, w1, w2)

    return out3.reshape(B, C, H, W)  # free view back


if __name__ == "__main__":
    # Module config (channel must be >= reduction so channel // reduction > 0).
    B, C, H, W = 2, 64, 16, 16
    reduction = 16
    Cr = C // reduction

    key = jax.random.PRNGKey(0)
    kx, k1, k2 = jax.random.split(key, 3)

    x = jax.random.normal(kx, (B, C, H, W), dtype=jnp.float32)
    # Deterministic synthetic weights in torch nn.Linear layout.
    w1 = jax.random.normal(k1, (Cr, C), dtype=jnp.float32) * 0.1   # fc[0].weight
    w2 = jax.random.normal(k2, (C, Cr), dtype=jnp.float32) * 0.1   # fc[2].weight

    out = se_layer(x, w1, w2)
    out = jax.block_until_ready(out)

    # Pure-JAX reference (mirrors the PyTorch module exactly).
    pooled = jnp.mean(x, axis=(2, 3))                              # (B, C)
    y = jax.nn.sigmoid(jnp.maximum(pooled @ w1.T, 0.0) @ w2.T)     # (B, C)
    ref = x * y[:, :, None, None]
    assert jnp.allclose(out, ref, atol=1e-5, rtol=1e-5), "mismatch vs reference"

    print("KERNEL_OK")
</pallas_src>

<mosaic_0001>
module attributes {stable_mosaic.version = 11 : i64} {
  func.func @se_kernel(%arg0: i32, %arg1: memref<1x64x256xf32, #tpu.memory_space<vmem>>, %arg2: memref<4x64xf32, #tpu.memory_space<vmem>>, %arg3: memref<64x4xf32, #tpu.memory_space<vmem>>, %arg4: memref<1x64x256xf32, #tpu.memory_space<vmem>>) attributes {dimension_semantics = [#tpu.dimension_semantics<parallel>], iteration_bounds = array<i64: 2>, scalar_prefetch = 0 : i64, scratch_operands = 0 : i64, tpu.core_type = #tpu.core_type<tc>, window_params = [{transform_indices = @transform_0, window_bounds = array<i64: 1, 64, 256>}, {pipeline_mode = #tpu.pipeline_mode<synchronous>, transform_indices = @transform_1, window_bounds = array<i64: 4, 64>}, {pipeline_mode = #tpu.pipeline_mode<synchronous>, transform_indices = @transform_2, window_bounds = array<i64: 64, 4>}, {transform_indices = @transform_3, window_bounds = array<i64: 1, 64, 256>}]} {
    %cst = arith.constant 1.000000e+00 : f32
    %0 = vector.broadcast %cst : f32 to vector<256x1xf32>
    %c0 = arith.constant 0 : index
    %c0_0 = arith.constant 0 : index
    %c0_1 = arith.constant 0 : index
    %1 = vector.load %arg1[%c0, %c0_0, %c0_1] : memref<1x64x256xf32, #tpu.memory_space<vmem>>, vector<1x64x256xf32>
    %2 = vector.shape_cast %1 : vector<1x64x256xf32> to vector<64x256xf32>
    %cst_2 = arith.constant dense<0.000000e+00> : vector<64x1xf32>
    %3 = tpu.matmul %2, %0, %cst_2 {dimension_numbers = #tpu.dot_dimension_numbers<[1], [0], [0], [1], [0, 0, 1, 1], [], []>} : vector<64x256xf32>, vector<256x1xf32>, vector<64x1xf32> -> vector<64x1xf32>
    %cst_3 = arith.constant 3.906250e-03 : f32
    %4 = vector.broadcast %cst_3 : f32 to vector<64x1xf32>
    %5 = arith.mulf %3, %4 : vector<64x1xf32>
    %c0_4 = arith.constant 0 : index
    %c0_5 = arith.constant 0 : index
    %6 = vector.load %arg2[%c0_4, %c0_5] : memref<4x64xf32, #tpu.memory_space<vmem>>, vector<4x64xf32>
    %cst_6 = arith.constant dense<0.000000e+00> : vector<4x1xf32>
    %7 = tpu.matmul %6, %5, %cst_6 {dimension_numbers = #tpu.dot_dimension_numbers<[1], [0], [0], [1], [0, 0, 1, 1], [], []>} : vector<4x64xf32>, vector<64x1xf32>, vector<4x1xf32> -> vector<4x1xf32>
    %cst_7 = arith.constant 0.000000e+00 : f32
    %8 = vector.broadcast %cst_7 : f32 to vector<4x1xf32>
    %9 = arith.maximumf %7, %8 : vector<4x1xf32>
    %c0_8 = arith.constant 0 : index
    %c0_9 = arith.constant 0 : index
    %10 = vector.load %arg3[%c0_8, %c0_9] : memref<64x4xf32, #tpu.memory_space<vmem>>, vector<64x4xf32>
    %cst_10 = arith.constant dense<0.000000e+00> : vector<64x1xf32>
    %11 = tpu.matmul %10, %9, %cst_10 {dimension_numbers = #tpu.dot_dimension_numbers<[1], [0], [0], [1], [0, 0, 1, 1], [], []>} : vector<64x4xf32>, vector<4x1xf32>, vector<64x1xf32> -> vector<64x1xf32>
    %12 = arith.negf %11 : vector<64x1xf32>
    %13 = math.exp %12 : vector<64x1xf32>
    %cst_11 = arith.constant 1.000000e+00 : f32
    %14 = vector.broadcast %cst_11 : f32 to vector<64x1xf32>
    %15 = arith.addf %14, %13 : vector<64x1xf32>
    %16 = arith.divf %14, %15 : vector<64x1xf32>
    %17 = vector.broadcast %16 : vector<64x1xf32> to vector<64x256xf32>
    %18 = arith.mulf %2, %17 : vector<64x256xf32>
    %c0_12 = arith.constant 0 : index
    %c0_13 = arith.constant 0 : index
    %c0_14 = arith.constant 0 : index
    %19 = vector.load %arg4[%c0_12, %c0_13, %c0_14] : memref<1x64x256xf32, #tpu.memory_space<vmem>>, vector<1x64x256xf32>
    %20 = vector.shape_cast %19 : vector<1x64x256xf32> to vector<64x256xf32>
    %21 = vector.shape_cast %18 : vector<64x256xf32> to vector<1x64x256xf32>
    tpu.vector_store %arg4[%c0_12, %c0_13, %c0_14], %21 {strides = array<i32>} : memref<1x64x256xf32, #tpu.memory_space<vmem>>, vector<1x64x256xf32>,
    return
  }
  func.func @transform_0(%arg0: i32) -> (i32, i32, i32) {
    %c0_i32 = arith.constant 0 : i32
    %c0_i32_0 = arith.constant 0 : i32
    %c0_i32_1 = arith.constant 0 : i32
    return %arg0, %c0_i32, %c0_i32_0 : i32, i32, i32
  }
  func.func @transform_1(%arg0: i32) -> (i32, i32) {
    %c0_i32 = arith.constant 0 : i32
    %c0_i32_0 = arith.constant 0 : i32
    %c0_i32_1 = arith.constant 0 : i32
    return %c0_i32, %c0_i32_0 : i32, i32
  }
  func.func @transform_2(%arg0: i32) -> (i32, i32) {
    %c0_i32 = arith.constant 0 : i32
    %c0_i32_0 = arith.constant 0 : i32
    %c0_i32_1 = arith.constant 0 : i32
    return %c0_i32, %c0_i32_0 : i32, i32
  }
  func.func @transform_3(%arg0: i32) -> (i32, i32, i32) {
    %c0_i32 = arith.constant 0 : i32
    %c0_i32_0 = arith.constant 0 : i32
    %c0_i32_1 = arith.constant 0 : i32
    return %arg0, %c0_i32, %c0_i32_0 : i32, i32, i32
  }
}

</mosaic_0001>

<bundles_post_ra>
// kernel: tpu_custom_call.1
= control target key start
LH: loop header
LB: loop body
LE: loop exit
PB: predicated region body
PF: predicated region fallthrough
CT: control target
= control target key end

     0   :  { %8 = vsyncpa [#allocation3], 0  ;;  %s1322_s0 = inlined_call_operand.hbm [shape: f32[2,64,256], index: 0, kind: input, shape index: {}]   ;;  %s1323_s1 = inlined_call_operand.vmem [shape: f32[4,64], index: 1, kind: input, shape index: {}]   ;;  %s1324_s2 = inlined_call_operand.vmem [shape: f32[64,4], index: 2, kind: input, shape index: {}]   ;;  %s1325_s3 = inlined_call_operand.hbm [shape: f32[2,64,256], index: 3, kind: output, shape index: {}]  }
   0x1   :  { %10 = vsyncpa [#allocation3 + $0x1], 0 }
   0x2   :  { %11 = vsyncpa [#allocation4], 0 }
   0x3   :  { %13 = vsyncpa [#allocation4 + $0x1], 0  ;;  %s991_s12 = smov 0   ;;  %s993_s13 = smov 0  }
   0x4   :  { %s995_s14 = smov 0   ;;  %s997_s15 = smov 0  }
   0x5 LB: > { %s1012_s16 = sadd.s32 4294967295, %s963_s15   ;;  %s714_s17 = sadd.s32 4294967294, %s963_s15   ;;  %s963_s15 = sphi %s997_s15, %s1335_s15   ;;  %s959_s14 = sphi %s995_s14, %s1334_s14   ;;  %s955_s13 = sphi %s993_s13, %s1333_s13   ;;  %s951_s12 = sphi %s991_s12, %s1332_s12  }
   0x6   : > { %s1016_s18 = sadd.s32 1, %s963_s15   ;;  %s26_s19 = sadd.s32 1, %s959_s14 }
   0x7   : > { %s23_s20 = ssub.s32 %s963_s15, %s1016_s18  ;;  %p33_p0 = scmp.ne.s32.totalorder %s959_s14, %s955_s13 }
   0x8   : > { %p24_p1 = scmp.eq.s32.totalorder %s23_s20, 0  ;;  %p34_p2 = scmp.eq.s32.totalorder %s963_s15, 0 }
   0x9   : > { %p39_p3 = scmp.ne.s32.totalorder %s955_s13, %s951_s12  ;;  %p40_p4 = scmp.eq.s32.totalorder %s1012_s16, 0 }
   0xa   : > { %s1028_s21 = scalar_select %p24_p1, %s959_s14, %s26_s19  }
   0xb   : > { %p1030_p5 = por %p34_p2, %p33_p0  ;;  %p1034_p6 = por %p40_p4, %p39_p3 }
   0xc   : > { %p105_p7 = scmp.eq.s32.totalorder %s1012_s16, 1  ;;  %p111_p8 = scmp.eq.s32.totalorder %s714_s17, 1 }
   0xd   : > { %p792_p10 = scmp.lt.s32.totalorder %s963_s15, 2  ;;  %s137_s26 = sand.u32 1, %s959_s14  }
   0xe   : > { %p1041_p11 = por %p105_p7, %p33_p0  ;;  %p1045_p12 = por %p111_p8, %p39_p3 }
   0xf   : > { %s746_s27 = sshll.u32 %s963_s15, 7  ;;  %s717_s28 = sshll.u32 %s137_s26, 7 }
  0x10   : > { %s146_s4 = scalar_lea.hbm %s1322_s0, %s746_s27  ;;  %s141_s6 = scalar_lea.vmem [#allocation2], %s717_s28 }
  0x11   : > { %s147_s5 = sshll.u32 %s146_s4, 4  ;;  %s149_s7 = sshll.u32 %s141_s6, 4  ;;  %s148_s5 = int_to_ptr.hbm [resolvable:$true] %s147_s5  ;;  %s150_s7 = int_to_ptr.vmem [resolvable:$true] %s149_s7 }
  0x12   : > { %p1056_p13 = pnand %p792_p10, %p1030_p5  ;;  %p720_p0 = scmp.ge.s32.totalorder %s963_s15, 1 }
  0x13   : > { %p157_p1 = scmp.lt.s32.totalorder %s963_s15, 3  ;;  %s138_s9 = scalar_lea.sflag [#allocation3], %s137_s26 }
  0x14   : > { %s867_s10 = sshra.s32 %s148_s5, 4  ;;  %p871_p3 = pneg %p1056_p13  ;;  %s868_s10 = int_to_ptr.hbm [resolvable:$true] %s867_s10 }
  0x15   : > { %s869_s11 = scalar_lea.hbm %s868_s10, 128  ;;  %s874_s20 = scalar_lea.hbm %s1322_s0, 256 }
  0x16   : > { %p870_p2 = scmp.ne.s32.totalorder %s868_s10, %s869_s11  ;;  %p875_p5 = scmp.lt.s32.totalorder %s868_s10, %s1322_s0 }
  0x17   : > { %p876_p8 = scmp.lt.s32.totalorder %s874_s20, %s869_s11 }
  0x18   : > { %p872_p4 = pnand %p871_p3, %p870_p2 }
  0x19   : > { %p877_p10 = por %p876_p8, %p875_p5 }
  0x1a   : > { %p873_p7 = pneg %p872_p4 }
  0x1c   : > { %p878_p9 = pnand %p877_p10, %p873_p7 }
  0x1e   : > { %881 = shalt.err (!%p878_p9)
}
  0x1f   : > { %s965_s26 = smov 256   ;;  %s966_s28 = smov 16  }
  0x20   : > { %787 = dma.hbm_to_vmem [thread:$0]  (!%p1056_p13), %s148_s5, 2048, %s150_s7, %s138_s9, %s965_s26, %s965_s26, %s966_s28  }
  0x21   : > { %p158_p2 = pnand %p720_p0, %p157_p1 }
  0x22   : > { %s1077_s29 = sand.u32 (!%p158_p2), 1, %s955_s13  }
  0x23   : > { %161 = sbr.rel (%p158_p2) target bundleno = 737 (0x2e1), region = 32  ;;  %s721_s30 = sshll.u32 (!%p158_p2), %s1077_s29, 7 }
  0x24   : > { %s164_s4 = scalar_lea.sflag (!%p158_p2), [#allocation3], %s1077_s29  ;;  %s1083_s6 = scalar_lea.vmem (!%p158_p2), [#allocation2], %s721_s30 }
  0x28   : > { %942 = dma.done.wait (%p1034_p6), %s164_s4, 2048  }
  0x29   : > { %944 = vsyncadd (%p1034_p6), %s164_s4, 4294965248  ;;  %v967_v0 = vmov 1.0   ;;  %v1135_v1 = vld [vmem:[%s1083_s6] sm:$0xff]  ;;  %v1138_v2 = vld [vmem:[%s1083_s6 + $0x8] sm:$0xff]  ;;  %vm298_vm0 = vcmask 523264   ;;  %vm356_vm1 = vcmask 1043456  }
  0x2a   : > { %748 = vmatpush.msra.mxu2 %v967_v0  ;;  %207 = vmatpush.msra.mxu0 %v967_v0  ;;  %v1145_v3 = vld [vmem:[%s1083_s6 + $0x60] sm:$0xff]  ;;  %v1154_v4 = vld [vmem:[%s1083_s6 + $0x10] sm:$0xff]  ;;  %v1157_v5 = vld [vmem:[%s1083_s6 + $0x18] sm:$0xff]  ;;  %vm331_vm2 = vcmask 31744   ;;  %v968_v60 = vmov 0   ;;  %s1256_s7 = scalar_lea.vmem [#allocation5], %s721_s30 }
  0x2b   : > { %248 = vmatpush.msra.mxu1 %v967_v0  ;;  %v1161_v6 = vld [vmem:[%s1083_s6 + $0x70] sm:$0xff]  ;;  %v1170_v7 = vld [vmem:[%s1083_s6 + $0x20] sm:$0xff]  ;;  %v1173_v8 = vld [vmem:[%s1083_s6 + $0x28] sm:$0xff]  ;;  %832 = vset.pattern.permute.xlu0 %v968_v60  ;;  %s747_s30 = sshll.u32 %s1012_s16, 7  ;;  %s638_s11 = sshll.u32 %s1256_s7, 4  ;;  %s639_s11 = int_to_ptr.vmem [resolvable:$true] %s638_s11 }
  0x2c   : > { %749 = vmatpush.msra.mxu2 %v967_v0  ;;  %208 = vmatpush.msra.mxu0 %v967_v0  ;;  %v1182_v9 = vld [vmem:[%s1083_s6 + $0x30] sm:$0xff]  ;;  %v1185_v10 = vld [vmem:[%s1083_s6 + $0x38] sm:$0xff]  ;;  %v1193_v11 = vld [vmem:[%s1083_s6 + $0x68] sm:$0xff]  ;;  %s637_s10 = scalar_lea.hbm %s1325_s3, %s747_s30  ;;  %s626_s16 = scalar_lea.sflag [#allocation4], %s1077_s29 }
  0x2d   : > { %249 = vmatpush.msra.mxu1 %v967_v0  ;;  %v1197_v12 = vld [vmem:[%s1083_s6 + $0x40] sm:$0xff]  ;;  %v1200_v13 = vld [vmem:[%s1083_s6 + $0x48] sm:$0xff]  ;;  %v1206_v14 = vld [vmem:[%s1083_s6 + $0x78] sm:$0xff]  ;;  %833 = vset.pattern.permute.xlu1 %v968_v60  ;;  %s640_s17 = sshll.u32 %s637_s10, 4  ;;  %s917_s26 = scalar_lea.hbm %s1325_s3, 256  ;;  %s641_s17 = int_to_ptr.hbm [resolvable:$true] %s640_s17 }
  0x2e   : > { %750 = vmatpush.msra.mxu2 %v967_v0  ;;  %209 = vmatpush.msra.mxu0 %v967_v0  ;;  %v1209_v15 = vld [vmem:[%s1083_s6 + $0x50] sm:$0xff]  ;;  %v1212_v16 = vld [vmem:[%s1083_s6 + $0x58] sm:$0xff]  ;;  %v297_v49 = vld [vmem:[%s1323_s1] sm:$0xf]  ;;  %s911_s19 = sshra.s32 %s641_s17, 4  ;;  %s912_s19 = int_to_ptr.hbm [resolvable:$true] %s911_s19 }
  0x2f   : > { %250 = vmatpush.msra.mxu1 %v967_v0  ;;  %v323_v52 = vld [vmem:[%s1324_s2] sm:$0xff]  ;;  %v324_v53 = vld [vmem:[%s1324_s2 + $0x8] sm:$0xff]  ;;  %v325_v54 = vld [vmem:[%s1324_s2 + $0x10] sm:$0xff]  ;;  %834 = vset.pattern.permute.xlu2 %v968_v60  ;;  %s913_s20 = scalar_lea.hbm %s912_s19, 128  ;;  %p918_p0 = scmp.lt.s32.totalorder %s912_s19, %s1325_s3 }
  0x30   : > { %751 = vmatpush.msra.mxu2 %v967_v0  ;;  %210 = vmatpush.msra.mxu0 %v967_v0  ;;  %v326_v55 = vld [vmem:[%s1324_s2 + $0x18] sm:$0xff]  ;;  %v327_v56 = vld [vmem:[%s1324_s2 + $0x20] sm:$0xff]  ;;  %v328_v57 = vld [vmem:[%s1324_s2 + $0x28] sm:$0xff]  ;;  %p914_p6 = scmp.ne.s32.totalorder %s912_s19, %s913_s20  ;;  %p919_p1 = scmp.lt.s32.totalorder %s917_s26, %s913_s20 }
  0x31   : > { %251 = vmatpush.msra.mxu1 %v967_v0  ;;  %v329_v58 = vld [vmem:[%s1324_s2 + $0x30] sm:$0xff]  ;;  %v330_v59 = vld [vmem:[%s1324_s2 + $0x38] sm:$0xff] }
  0x32   : > { %752 = vmatpush.msra.mxu2 %v967_v0  ;;  %211 = vmatpush.msra.mxu0 %v967_v0  ;;  %p915_p9 = pnand %p914_p6, %p1041_p11  ;;  %p920_p3 = por %p919_p1, %p918_p0 }
  0x33   : > { %252 = vmatpush.msra.mxu1 %v967_v0 }
  0x34   : > { %753 = vmatpush.msra.mxu2 %v967_v0  ;;  %212 = vmatpush.msra.mxu0 %v967_v0  ;;  %p916_p13 = pneg %p915_p9 }
  0x35   : > { %253 = vmatpush.msra.mxu1 %v967_v0 }
  0x36   : > { %754 = vmatpush.msra.mxu2 %v967_v0  ;;  %213 = vmatpush.msra.mxu0 %v967_v0  ;;  %p921_p4 = pnand %p920_p3, %p916_p13 }
  0x37   : > { %254 = vmatpush.msra.mxu1 %v967_v0 }
  0x38   : > { %755 = vmatpush.msra.mxu2 %v967_v0  ;;  %214 = vmatpush.msra.mxu0 %v967_v0 }
  0x39   : > { %255 = vmatpush.msra.mxu1 %v967_v0 }
  0x3a   : > { %756 = vmatpush.msra.mxu2 %v967_v0  ;;  %215 = vmatpush.msra.mxu0 %v967_v0 }
  0x3b   : > { %256 = vmatpush.msra.mxu1 %v967_v0 }
  0x3c   : > { %757 = vmatpush.msra.mxu2 %v967_v0  ;;  %216 = vmatpush.msra.mxu0 %v967_v0 }
  0x3d   : > { %257 = vmatpush.msra.mxu1 %v967_v0 }
  0x3e   : > { %758 = vmatpush.msra.mxu2 %v967_v0  ;;  %217 = vmatpush.msra.mxu0 %v967_v0 }
  0x3f   : > { %258 = vmatpush.msra.mxu1 %v967_v0 }
  0x40   : > { %759 = vmatpush.msra.mxu2 %v967_v0  ;;  %218 = vmatpush.msra.mxu0 %v967_v0 }
  0x41   : > { %259 = vmatpush.msra.mxu1 %v967_v0 }
  0x42   : > { %760 = vmatpush.msra.mxu2 %v967_v0  ;;  %219 = vmatpush.msra.mxu0 %v967_v0 }
  0x43   : > { %260 = vmatpush.msra.mxu1 %v967_v0 }
  0x44   : > { %761 = vmatpush.msra.mxu2 %v967_v0  ;;  %220 = vmatpush.msra.mxu0 %v967_v0 }
  0x45   : > { %261 = vmatpush.msra.mxu1 %v967_v0 }
  0x46   : > { %762 = vmatpush.msra.mxu2 %v967_v0  ;;  %221 = vmatpush.msra.mxu0 %v967_v0 }
  0x47   : > { %262 = vmatpush.msra.mxu1 %v967_v0 }
  0x48   : > { %763 = vmatpush.msra.mxu2 %v967_v0  ;;  %222 = vmatpush.msra.mxu0 %v967_v0 }
  0x49   : > { %263 = vmatpush.msra.mxu1 %v967_v0  ;;  %223 = vmatmul.f32.vlgmr.msra.gmra.mxu0 %v1135_v1 }
  0x4a   : > { %764 = vmatpush.msrb.mxu2 %v967_v0  ;;  %264 = vmatmul.f32.vlgmr.msra.gmra.mxu1 %v1138_v2 }
  0x4b   : > { %241 = vmatmul.f32.vlgmr.msra.gmra.mxu2 %v1145_v3 }
  0x4c   : > { %765 = vmatpush.msrb.mxu2 %v967_v0 }
  0x4e   : > { %766 = vmatpush.msrb.mxu2 %v967_v0 }
  0x50   : > { %767 = vmatpush.msrb.mxu2 %v967_v0 }
  0x51   : > { %226 = vmatmul.f32.gmra.mxu0 %v1154_v4 }
  0x52   : > { %768 = vmatpush.msrb.mxu2 %v967_v0  ;;  %267 = vmatmul.f32.gmra.mxu1 %v1157_v5 }
  0x53   : > { %244 = vmatmul.f32.gmra.mxu2 %v1161_v6 }
  0x54   : > { %769 = vmatpush.msrb.mxu2 %v967_v0 }
  0x56   : > { %770 = vmatpush.msrb.mxu2 %v967_v0 }
  0x58   : > { %771 = vmatpush.msrb.mxu2 %v967_v0 }
  0x59   : > { %229 = vmatmul.f32.gmra.mxu0 %v1170_v7 }
  0x5a   : > { %772 = vmatpush.msrb.mxu2 %v967_v0  ;;  %270 = vmatmul.f32.gmra.mxu1 %v1173_v8 }
  0x5c   : > { %773 = vmatpush.msrb.mxu2 %v967_v0 }
  0x5e   : > { %774 = vmatpush.msrb.mxu2 %v967_v0 }
  0x60   : > { %775 = vmatpush.msrb.mxu2 %v967_v0 }
  0x61   : > { %232 = vmatmul.f32.gmra.mxu0 %v1182_v9 }
  0x62   : > { %776 = vmatpush.msrb.mxu2 %v967_v0  ;;  %273 = vmatmul.f32.gmra.mxu1 %v1185_v10 }
  0x64   : > { %777 = vmatpush.msrb.mxu2 %v967_v0 }
  0x66   : > { %778 = vmatpush.msrb.mxu2 %v967_v0 }
  0x68   : > { %779 = vmatpush.msrb.mxu2 %v967_v0 }
  0x69   : > { %282 = vmatmul.f32.vlgmr.msrb.gmra.mxu2 %v1193_v11  ;;  %235 = vmatmul.f32.gmra.mxu0 %v1197_v12 }
  0x6a   : > { %276 = vmatmul.f32.gmra.mxu1 %v1200_v13 }
  0x71   : > { %285 = vmatmul.f32.gmra.mxu2 %v1206_v14  ;;  %238 = vmatmul.f32.gmra.mxu0 %v1209_v15 }
  0x72   : > { %279 = vmatmul.f32.gmra.mxu1 %v1212_v16 }
  0xc6   : > { %v224_v17 = vpop.f32.mrf.mxu0 }
  0xc7   : > { %v265_v18 = vpop.f32.mrf.mxu1 }
  0xc8   : > { %v266_v45 = vadd.f32 %v265_v18, %v224_v17 }
  0xca   : > { %v289_v48 = vmul.f32 0.00390625, %v266_v45 }
  0xce   : > { %v227_v19 = vpop.f32.mrf.mxu0  ;;  %v242_v21 = vpop.f32.mrf.mxu2 }
  0xcf   : > { %v268_v20 = vpop.f32.mrf.mxu1 }
  0xd0   : > { %v269_v43 = vadd.f32 %v268_v20, %v227_v19 }
  0xd2   : > { %v290_v47 = vmul.f32 0.00390625, %v269_v43 }
  0xd6   : > { %v230_v22 = vpop.f32.mrf.mxu0  ;;  %v245_v26 = vpop.f32.mrf.mxu2 }
  0xd7   : > { %v271_v23 = vpop.f32.mrf.mxu1 }
  0xd8   : > { %v272_v41 = vadd.f32 %v271_v23, %v230_v22 }
  0xda   : > { %v291_v46 = vmul.f32 0.00390625, %v272_v41 }
  0xde   : > { %v233_v24 = vpop.f32.mrf.mxu0 }
  0xdf   : > { %v274_v25 = vpop.f32.mrf.mxu1 }
  0xe0   : > { %v275_v40 = vadd.f32 %v274_v25, %v233_v24 }
  0xe2   : > { %v292_v44 = vmul.f32 0.00390625, %v275_v40 }
  0xe6   : > { %v236_v27 = vpop.f32.mrf.mxu0 }
  0xe7   : > { %v277_v28 = vpop.f32.mrf.mxu1 }
  0xe8   : > { %v278_v38 = vadd.f32 %v277_v28, %v236_v27 }
  0xea   : > { %v293_v42 = vmul.f32 0.00390625, %v278_v38 }
  0xec   : > { %v283_v29 = vpop.f32.mrf.mxu2 }
  0xed   : > { %v284_v33 = vadd.f32 %v283_v29, %v242_v21 }
  0xee   : > { %v239_v30 = vpop.f32.mrf.mxu0 }
  0xef   : > { %v280_v31 = vpop.f32.mrf.mxu1  ;;  %v295_v37 = vmul.f32 0.00390625, %v284_v33 }
  0xf0   : > { %v281_v35 = vadd.f32 %v280_v31, %v239_v30 }
  0xf2   : > { %v294_v39 = vmul.f32 0.00390625, %v281_v35 }
  0xf4   : > { %v286_v32 = vpop.f32.mrf.mxu2 }
  0xf5   : > { %v287_v34 = vadd.f32 %v286_v32, %v245_v26 }
  0xf7   : > { %v296_v36 = vmul.f32 0.00390625, %v287_v34 }
  0xf9   : > { %310 = vmatpush.msra.mxu2 %v296_v36 }
  0xfb   : > { %311 = vmatpush.msra.mxu2 %v295_v37 }
  0xfd   : > { %312 = vmatpush.msra.mxu2 %v294_v39 }
  0xff   : > { %313 = vmatpush.msra.mxu2 %v293_v42 }
 0x101   : > { %314 = vmatpush.msra.mxu2 %v292_v44 }
 0x103   : > { %315 = vmatpush.msra.mxu2 %v291_v46 }
 0x105   : > { %316 = vmatpush.msra.mxu2 %v290_v47 }
 0x107   : > { %317 = vmatpush.msra.mxu2 %v289_v48 }
 0x108   : > { %723 = vmatmul.msk.f32.vlgmr.msra.gmra.mxu2 %vm298_vm0, %v297_v49 }
 0x18b   : > { %v319_v50 = vpop.f32.mrf.mxu2 }
 0x18c   : > { %v322_v51 = vmax.f32 %v319_v50, 0.0 }
 0x18e   : > { %724 = vmatpush.msk.msra.mxu3 %vm356_vm1, %v322_v51 }
 0x18f   : > { %725 = vmatmul.msk.f32.vlgmr.msra.gmra.mxu3 %vm331_vm2, %v323_v52 }
 0x197   : > { %726 = vmatmul.msk.f32.gmra.mxu3 %vm331_vm2, %v324_v53 }
 0x19f   : > { %727 = vmatmul.msk.f32.gmra.mxu3 %vm331_vm2, %v325_v54 }
 0x1a7   : > { %728 = vmatmul.msk.f32.gmra.mxu3 %vm331_vm2, %v326_v55 }
 0x1af   : > { %729 = vmatmul.msk.f32.gmra.mxu3 %vm331_vm2, %v327_v56 }
 0x1b7   : > { %730 = vmatmul.msk.f32.gmra.mxu3 %vm331_vm2, %v328_v57 }
 0x1bf   : > { %731 = vmatmul.msk.f32.gmra.mxu3 %vm331_vm2, %v329_v58 }
 0x1c7   : > { %732 = vmatmul.msk.f32.gmra.mxu3 %vm331_vm2, %v330_v59 }
 0x212   : > { %v377_v61 = vpop.f32.mrf.mxu3 }
 0x213   : > { %v733_v62 = vmul.f32 -1.442695, %v377_v61 }
 0x215   : > { %835 = vpow2.f32 %v733_v62 }
 0x21a   : > { %v380_v63 = vpop.f32.mrf.mxu3 }
 0x21b   : > { %v836_v0 = vpop.eup %835  ;;  %v734_v17 = vmul.f32 -1.442695, %v380_v63 }
 0x21c   : > { %v425_v18 = vadd.f32 1.0, %v836_v0 }
 0x21d   : > { %837 = vpow2.f32 %v734_v17 }
 0x21e   : > { %839 = vrcp.f32 %v425_v18  ;;  %v444_v26 = vand.u32 2147483648, %v425_v18  ;;  %v442_v28 = vand.u32 2147483647, %v425_v18  ;;  %vm438_vm4 = vweird.f32 %v425_v18 }
 0x220   : > { %v445_v35 = vor.u32 1.1754944e-38, %v444_v26  ;;  %vm443_vm6 = vcmp.eq.f32.partialorder %v442_v28, 8.507059e+37 }
 0x222   : > { %v383_v19 = vpop.f32.mrf.mxu3 }
 0x223   : > { %v838_v20 = vpop.eup %837  ;;  %v735_v21 = vmul.f32 -1.442695, %v383_v19 }
 0x224   : > { %v840_v22 = vpop.eup %839  ;;  %v426_v23 = vadd.f32 1.0, %v838_v20 }
 0x225   : > { %841 = vpow2.f32 %v735_v21  ;;  %v434_v24 = vmul.f32 %v840_v22, %v425_v18  ;;  %vm439_vm3 = vweird.f32 %v840_v22 }
 0x226   : > { %843 = vrcp.f32 %v426_v23  ;;  %vm440_vm5 = vmor %vm438_vm4, %vm439_vm3  ;;  %v459_v40 = vand.u32 2147483648, %v426_v23  ;;  %v457_v42 = vand.u32 2147483647, %v426_v23  ;;  %vm453_vm8 = vweird.f32 %v426_v23 }
 0x227   : > { %v435_v25 = vsub.f32 1.0, %v434_v24 }
 0x228   : > { %v460_v49 = vor.u32 1.1754944e-38, %v459_v40  ;;  %vm458_vm10 = vcmp.eq.f32.partialorder %v457_v42, 8.507059e+37 }
 0x229   : > { %v436_v27 = vmul.f32 %v840_v22, %v435_v25 }
 0x22a   : > { %v386_v29 = vpop.f32.mrf.mxu3 }
 0x22b   : > { %v842_v30 = vpop.eup %841  ;;  %v736_v31 = vmul.f32 -1.442695, %v386_v29  ;;  %v437_v32 = vadd.f32 %v840_v22, %v436_v27 }
 0x22c   : > { %v844_v33 = vpop.eup %843  ;;  %v427_v34 = vadd.f32 1.0, %v842_v30 }
 0x22d   : > { %845 = vpow2.f32 %v736_v31  ;;  %v441_v36 = vsel %vm440_vm5, %v840_v22, %v437_v32  ;;  %v449_v37 = vmul.f32 %v844_v33, %v426_v23  ;;  %vm454_vm7 = vweird.f32 %v844_v33 }
 0x22e   : > { %847 = vrcp.f32 %v427_v34  ;;  %v446_v38 = vsel %vm443_vm6, %v445_v35, %v441_v36  ;;  %vm455_vm9 = vmor %vm453_vm8, %vm454_vm7  ;;  %v474_v54 = vand.u32 2147483648, %v427_v34  ;;  %v472_v56 = vand.u32 2147483647, %v427_v34 }
 0x22f   : > { %555 = vperm.xlu0 %832, %v446_v38   ;;  %v450_v39 = vsub.f32 1.0, %v449_v37  ;;  %vm468_vm12 = vweird.f32 %v427_v34 }
 0x230   : > { %v475_v63 = vor.u32 1.1754944e-38, %v474_v54  ;;  %vm473_vm14 = vcmp.eq.f32.partialorder %v472_v56, 8.507059e+37 }
 0x231   : > { %v451_v41 = vmul.f32 %v844_v33, %v450_v39 }
 0x232   : > { %v389_v43 = vpop.f32.mrf.mxu3 }
 0x233   : > { %v846_v44 = vpop.eup %845  ;;  %v737_v45 = vmul.f32 -1.442695, %v389_v43  ;;  %v452_v46 = vadd.f32 %v844_v33, %v451_v41 }
 0x234   : > { %v848_v47 = vpop.eup %847  ;;  %v428_v48 = vadd.f32 1.0, %v846_v44 }
 0x235   : > { %849 = vpow2.f32 %v737_v45  ;;  %v456_v50 = vsel %vm455_vm9, %v844_v33, %v452_v46  ;;  %v464_v51 = vmul.f32 %v848_v47, %v427_v34  ;;  %vm469_vm11 = vweird.f32 %v848_v47 }
 0x236   : > { %851 = vrcp.f32 %v428_v48  ;;  %v461_v52 = vsel %vm458_vm10, %v460_v49, %v456_v50  ;;  %vm470_vm13 = vmor %vm468_vm12, %vm469_vm11  ;;  %v489_v20 = vand.u32 2147483648, %v428_v48  ;;  %v487_v22 = vand.u32 2147483647, %v428_v48 }
 0x237   : > { %560 = vperm.xlu0 %832, %v461_v52   ;;  %v465_v53 = vsub.f32 1.0, %v464_v51  ;;  %vm483_vm0 = vweird.f32 %v428_v48 }
 0x238   : > { %v490_v29 = vor.u32 1.1754944e-38, %v489_v20  ;;  %vm488_vm2 = vcmp.eq.f32.partialorder %v487_v22, 8.507059e+37 }
 0x239   : > { %v466_v55 = vmul.f32 %v848_v47, %v465_v53 }
 0x23a   : > { %v392_v57 = vpop.f32.mrf.mxu3 }
 0x23b   : > { %v850_v58 = vpop.eup %849  ;;  %v738_v59 = vmul.f32 -1.442695, %v392_v57  ;;  %v467_v60 = vadd.f32 %v848_v47, %v466_v55 }
 0x23c   : > { %v852_v61 = vpop.eup %851  ;;  %v429_v62 = vadd.f32 1.0, %v850_v58 }
 0x23d   : > { %853 = vpow2.f32 %v738_v59  ;;  %v471_v0 = vsel %vm470_vm13, %v848_v47, %v467_v60  ;;  %v479_v17 = vmul.f32 %v852_v61, %v428_v48  ;;  %vm484_vm15 = vweird.f32 %v852_v61 }
 0x23e   : > { %855 = vrcp.f32 %v429_v62  ;;  %v476_v18 = vsel %vm473_vm14, %v475_v63, %v471_v0  ;;  %vm485_vm1 = vmor %vm483_vm0, %vm484_vm15  ;;  %v504_v34 = vand.u32 2147483648, %v429_v62  ;;  %v502_v36 = vand.u32 2147483647, %v429_v62 }
 0x23f   : > { %565 = vperm.xlu1 %833, %v476_v18   ;;  %v480_v19 = vsub.f32 1.0, %v479_v17  ;;  %vm498_vm4 = vweird.f32 %v429_v62 }
 0x240   : > { %v505_v43 = vor.u32 1.1754944e-38, %v504_v34  ;;  %vm503_vm6 = vcmp.eq.f32.partialorder %v502_v36, 8.507059e+37 }
 0x241   : > { %v481_v21 = vmul.f32 %v852_v61, %v480_v19 }
 0x242   : > { %v395_v23 = vpop.f32.mrf.mxu3 }
 0x243   : > { %v854_v24 = vpop.eup %853  ;;  %v739_v25 = vmul.f32 -1.442695, %v395_v23  ;;  %v482_v26 = vadd.f32 %v852_v61, %v481_v21 }
 0x244   : > { %v856_v27 = vpop.eup %855  ;;  %v430_v28 = vadd.f32 1.0, %v854_v24 }
 0x245   : > { %857 = vpow2.f32 %v739_v25  ;;  %v486_v30 = vsel %vm485_vm1, %v852_v61, %v482_v26  ;;  %v494_v31 = vmul.f32 %v856_v27, %v429_v62  ;;  %vm499_vm3 = vweird.f32 %v856_v27 }
 0x246   : > { %859 = vrcp.f32 %v430_v28  ;;  %v491_v32 = vsel %vm488_vm2, %v490_v29, %v486_v30  ;;  %vm500_vm5 = vmor %vm498_vm4, %vm499_vm3  ;;  %v519_v48 = vand.u32 2147483648, %v430_v28  ;;  %v517_v50 = vand.u32 2147483647, %v430_v28 }
 0x247   : > { %570 = vperm.xlu1 %833, %v491_v32   ;;  %v495_v33 = vsub.f32 1.0, %v494_v31  ;;  %vm513_vm8 = vweird.f32 %v430_v28 }
 0x248   : > { %v520_v55 = vor.u32 1.1754944e-38, %v519_v48  ;;  %vm518_vm10 = vcmp.eq.f32.partialorder %v517_v50, 8.507059e+37 }
 0x249   : > { %v496_v35 = vmul.f32 %v856_v27, %v495_v33 }
 0x24a   : > { %v398_v37 = vpop.f32.mrf.mxu3 }
 0x24b   : > { %v858_v38 = vpop.eup %857  ;;  %v740_v39 = vmul.f32 -1.442695, %v398_v37  ;;  %v497_v40 = vadd.f32 %v856_v27, %v496_v35 }
 0x24c   : > { %v860_v41 = vpop.eup %859  ;;  %v431_v42 = vadd.f32 1.0, %v858_v38 }
 0x24d   : > { %861 = vpow2.f32 %v740_v39  ;;  %v501_v44 = vsel %vm500_vm5, %v856_v27, %v497_v40  ;;  %v509_v45 = vmul.f32 %v860_v41, %v430_v28  ;;  %vm514_vm7 = vweird.f32 %v860_v41 }
 0x24e   : > { %863 = vrcp.f32 %v431_v42  ;;  %v506_v46 = vsel %vm503_vm6, %v505_v43, %v501_v44  ;;  %vm515_vm9 = vmor %vm513_vm8, %vm514_vm7  ;;  %v534_v60 = vand.u32 2147483648, %v431_v42  ;;  %v532_v62 = vand.u32 2147483647, %v431_v42 }
 0x24f   : > { %575 = vperm.xlu2 %834, %v506_v46   ;;  %v510_v47 = vsub.f32 1.0, %v509_v45  ;;  %vm528_vm12 = vweird.f32 %v431_v42 }
 0x250   : > { %v535_v17 = vor.u32 1.1754944e-38, %v534_v60  ;;  %vm533_vm14 = vcmp.eq.f32.partialorder %v532_v62, 8.507059e+37 }
 0x251   : > { %v511_v49 = vmul.f32 %v860_v41, %v510_v47 }
 0x253   : > { %v862_v51 = vpop.eup %861  ;;  %v512_v52 = vadd.f32 %v860_v41, %v511_v49 }
 0x254   : > { %v864_v53 = vpop.eup %863  ;;  %v432_v54 = vadd.f32 1.0, %v862_v51 }
 0x255   : > { %v516_v56 = vsel %vm515_vm9, %v860_v41, %v512_v52  ;;  %v524_v57 = vmul.f32 %v864_v53, %v431_v42  ;;  %vm529_vm11 = vweird.f32 %v864_v53 }
 0x256   : > { %865 = vrcp.f32 %v432_v54  ;;  %v521_v58 = vsel %vm518_vm10, %v520_v55, %v516_v56  ;;  %vm530_vm13 = vmor %vm528_vm12, %vm529_vm11  ;;  %v549_v22 = vand.u32 2147483648, %v432_v54  ;;  %v547_v24 = vand.u32 2147483647, %v432_v54 }
 0x257   : > { %580 = vperm.xlu2 %834, %v521_v58   ;;  %v525_v59 = vsub.f32 1.0, %v524_v57  ;;  %vm543_vm0 = vweird.f32 %v432_v54 }
 0x258   : > { %v550_v26 = vor.u32 1.1754944e-38, %v549_v22  ;;  %vm548_vm2 = vcmp.eq.f32.partialorder %v547_v24, 8.507059e+37 }
 0x259   : > { %v526_v61 = vmul.f32 %v864_v53, %v525_v59 }
 0x25b   : > { %v527_v63 = vadd.f32 %v864_v53, %v526_v61 }
 0x25c   : > { %v866_v0 = vpop.eup %865 }
 0x25d   : > { %v531_v18 = vsel %vm530_vm13, %v864_v53, %v527_v63  ;;  %v539_v19 = vmul.f32 %v866_v0, %v432_v54  ;;  %vm544_vm15 = vweird.f32 %v866_v0 }
 0x25e   : > { %v536_v20 = vsel %vm533_vm14, %v535_v17, %v531_v18  ;;  %vm545_vm1 = vmor %vm543_vm0, %vm544_vm15 }
 0x25f   : > { %585 = vperm.xlu0 %832, %v536_v20   ;;  %v540_v21 = vsub.f32 1.0, %v539_v19 }
 0x261   : > { %v541_v23 = vmul.f32 %v866_v0, %v540_v21 }
 0x263   : > { %v542_v25 = vadd.f32 %v866_v0, %v541_v23 }
 0x265   : > { %v546_v27 = vsel %vm545_vm1, %v866_v0, %v542_v25 }
 0x266   : > { %v551_v28 = vsel %vm548_vm2, %v550_v26, %v546_v27 }
 0x267   : > { %590 = vperm.xlu1 %833, %v551_v28  }
 0x2a1   : > { %v556_v29 = vpop.permute.xlu0 %555 }
 0x2a2   : > { %v593_v30 = vmul.f32 %v556_v29, %v1135_v1  ;;  %v594_v31 = vmul.f32 %v556_v29, %v1138_v2 }
 0x2a4   : > { %609 = vst [vmem:[%s1256_s7] sm:$0xff] %v593_v30 }
 0x2a5   : > { %610 = vst [vmem:[%s1256_s7 + $0x8] sm:$0xff] %v594_v31 }
 0x2a9   : > { %v561_v32 = vpop.permute.xlu0 %560  ;;  %v576_v33 = vpop.permute.xlu2 %575 }
 0x2aa   : > { %v595_v34 = vmul.f32 %v561_v32, %v1154_v4  ;;  %v596_v1 = vmul.f32 %v561_v32, %v1157_v5  ;;  %v601_v2 = vmul.f32 %v576_v33, %v1197_v12  ;;  %v602_v35 = vmul.f32 %v576_v33, %v1200_v13 }
 0x2ac   : > { %611 = vst [vmem:[%s1256_s7 + $0x10] sm:$0xff] %v595_v34 }
 0x2ad   : > { %612 = vst [vmem:[%s1256_s7 + $0x18] sm:$0xff] %v596_v1 }
 0x2ae   : > { %617 = vst [vmem:[%s1256_s7 + $0x40] sm:$0xff] %v601_v2 }
 0x2af   : > { %618 = vst [vmem:[%s1256_s7 + $0x48] sm:$0xff] %v602_v35 }
 0x2b1   : > { %v566_v36 = vpop.permute.xlu1 %565  ;;  %v581_v37 = vpop.permute.xlu2 %580 }
 0x2b2   : > { %v597_v38 = vmul.f32 %v566_v36, %v1170_v7  ;;  %v598_v4 = vmul.f32 %v566_v36, %v1173_v8  ;;  %v603_v5 = vmul.f32 %v581_v37, %v1209_v15  ;;  %v604_v12 = vmul.f32 %v581_v37, %v1212_v16 }
 0x2b4   : > { %613 = vst [vmem:[%s1256_s7 + $0x20] sm:$0xff] %v597_v38 }
 0x2b5   : > { %614 = vst [vmem:[%s1256_s7 + $0x28] sm:$0xff] %v598_v4 }
 0x2b6   : > { %619 = vst [vmem:[%s1256_s7 + $0x50] sm:$0xff] %v603_v5 }
 0x2b7   : > { %620 = vst [vmem:[%s1256_s7 + $0x58] sm:$0xff] %v604_v12 }
 0x2b9   : > { %v571_v13 = vpop.permute.xlu1 %570 }
 0x2ba   : > { %v599_v39 = vmul.f32 %v571_v13, %v1182_v9  ;;  %v600_v40 = vmul.f32 %v571_v13, %v1185_v10 }
 0x2bc   : > { %615 = vst [vmem:[%s1256_s7 + $0x30] sm:$0xff] %v599_v39 }
 0x2bd   : > { %616 = vst [vmem:[%s1256_s7 + $0x38] sm:$0xff] %v600_v40 }
 0x2d1   : > { %v586_v7 = vpop.permute.xlu0 %585 }
 0x2d2   : > { %v605_v8 = vmul.f32 %v586_v7, %v1145_v3  ;;  %v606_v15 = vmul.f32 %v586_v7, %v1193_v11 }
 0x2d4   : > { %621 = vst [vmem:[%s1256_s7 + $0x60] sm:$0xff] %v605_v8 }
 0x2d5   : > { %622 = vst [vmem:[%s1256_s7 + $0x68] sm:$0xff] %v606_v15 }
 0x2d9   : > { %v591_v9 = vpop.permute.xlu1 %590 }
 0x2da   : > { %v607_v10 = vmul.f32 %v591_v9, %v1161_v6  ;;  %v608_v16 = vmul.f32 %v591_v9, %v1206_v14 }
 0x2dc   : > { %623 = vst [vmem:[%s1256_s7 + $0x70] sm:$0xff] %v607_v10 }
 0x2dd   : > { %624 = vst [vmem:[%s1256_s7 + $0x78] sm:$0xff] %v608_v16 }
 0x2de   : > { %924 = shalt.err (!%p921_p4)
}
 0x2df   : > { %s969_s29 = smov 256   ;;  %s970_s6 = smov 16  }
 0x2e0   : > { %782 = dma.vmem_to_hbm [thread:$0]  (%p1041_p11), %s639_s11, 2048, %s641_s17, %s626_s16, %s969_s29, %s969_s29, %s970_s6  }
 0x2e1 PF: > { %s655_s23 = sand.u32 1, %s951_s12   ;;  %p1331_p7 = scmp.ge.s32.totalorder %s963_s15, 2 }
 0x2e2   : > { %s656_s5 = scalar_lea.sflag [#allocation4], %s655_s23 }
 0x2e3   : > { %p789_p5 = pnand %p1331_p7, %p1045_p12 }
 0x2e5   : > { %p790_p8 = pneg %p789_p5 }
 0x2e7   : > { %946 = dma.done.wait (%p790_p8), %s656_s5, 2048  }
 0x2e8   : > { %948 = vsyncadd (%p790_p8), %s656_s5, 4294965248  ;;  %p16_p10 = scmp.ge.s32.totalorder %s1016_s18, 4   ;;  %s1332_s12 = smov %s955_s13 }
 0x2e9   : > { %s1333_s13 = smov %s959_s14  ;;  %s1334_s14 = smov %s1028_s21 }
 0x2ea   : > { %s1335_s15 = smov %s1016_s18  ;;  %18 = sbr.rel (!%p16_p10) target bundleno = 5 (0x5), region = 77 }
 0x2ef   :  { %662 = vsyncpa [#allocation3], 1 }
 0x2f0   :  { %664 = vsyncpa [#allocation3 + $0x1], 1 }
 0x2f1   :  { %665 = vsyncpa [#allocation4], 1 }
 0x2f2   :  { %667 = vsyncpa [#allocation4 + $0x1], 1 }

</bundles_post_ra>
